<compile_context>
chip_gen: v5e
topology: v5e:2x2
jax: 0.10.0
libtpu: 0.0.40
codegen_flags: <defaults>
</compile_context>

<pallas_src>
import functools

import jax
import jax.numpy as jnp
from jax import lax
from jax.experimental import pallas as pl
from jax.experimental.pallas import tpu as pltpu


def _gru_chunk_kernel(t_total, t_chunk, gi_ref, whh_ref, bhh_ref, hfin_ref,
                      h_scr):
    """Runs `t_chunk` GRU steps for one batch tile.

    gi_ref : (t_chunk, tile_b, 3H)  precomputed gi = x @ W_ih^T + b_ih
    whh_ref: (H, 3H)                W_hh^T, PyTorch gate order [r, z, n] (VMEM resident)
    bhh_ref: (1, 3H)                b_hh (VMEM resident)
    hfin_ref: (1, tile_b, H)        final hidden output (written on last chunk)
    h_scr  : (tile_b, H) f32        hidden state carried across time chunks
    """
    tc = pl.program_id(1)

    @pl.when(tc == 0)
    def _init():
        # PyTorch initHidden(): zeros.
        h_scr[...] = jnp.zeros_like(h_scr)

    tile_b, Hh = h_scr.shape
    whh = whh_ref[...]                               # load once per chunk
    # Hoist the bias broadcast out of the unrolled loop.
    bhh = jnp.broadcast_to(bhh_ref[...].astype(jnp.float32), (tile_b, 3 * Hh))
    base = tc * t_chunk
    needs_mask = (t_total % t_chunk) != 0            # static Python bool

    def step(i, h):
        gi = gi_ref[i].astype(jnp.float32)           # (tile_b, 3H), has b_ih folded in
        # Only per-step MXU work: h @ W_hh^T, operands in param dtype, f32 acc.
        gh = jnp.dot(h.astype(whh.dtype), whh,
                     preferred_element_type=jnp.float32) + bhh
        r = jax.nn.sigmoid(gi[:, :Hh] + gh[:, :Hh])
        z = jax.nn.sigmoid(gi[:, Hh:2 * Hh] + gh[:, Hh:2 * Hh])
        n = jnp.tanh(gi[:, 2 * Hh:] + r * gh[:, 2 * Hh:])
        h_new = (1.0 - z) * n + z * h
        if needs_mask:
            # Padded trailing time steps of the last chunk must not update h.
            h_new = jnp.where(base + i < t_total, h_new, h)
        return h_new

    h = lax.fori_loop(0, t_chunk, step, h_scr[...], unroll=True)
    h_scr[...] = h

    @pl.when(tc == pl.num_programs(1) - 1)
    def _write():
        hfin_ref[0] = h.astype(hfin_ref.dtype)


def prepare_question_params(embedding_weight, weight_ih, weight_hh, bias_ih,
                            bias_hh):
    """One-time parameter preparation (outside the per-call path).

    Folds the GRU input projection into the embedding table
    (emb_proj[v] = emb_w[v] @ W_ih^T + b_ih, shape (V, 3H)) and transposes
    W_hh once to (H, 3H).  Gate order is PyTorch's [r, z, n].
    Parameters may be f32 or bf16; the kernel accumulates in f32 either way.
    """
    emb_proj = embedding_weight @ jnp.transpose(weight_ih) + bias_ih[None, :]
    return (emb_proj.astype(embedding_weight.dtype),   # (V, 3H)
            jnp.transpose(weight_hh),                  # (H, 3H)
            bias_hh.reshape(1, -1))                    # (1, 3H)


def question_module_forward(questions, params, *, t_chunk=16):
    """questions: (B, T) int32.  params: from prepare_question_params."""
    emb_proj, w_hh_t, b_hh2 = params
    B, T = questions.shape
    H = w_hh_t.shape[0]
    assert w_hh_t.shape == (H, 3 * H) and emb_proj.shape[1] == 3 * H

    # questions.transpose(0, 1) + embedding lookup.  Because W_ih/b_ih are
    # folded into the table, this gather directly yields gi_seq: (T, B, 3H).
    gi_seq = jnp.take(emb_proj, jnp.transpose(questions), axis=0)

    # Batch tiling: split across megacore TensorCores when B is large enough
    # (sublane-aligned); small B runs as one full-extent tile.
    if B <= 8:
        tile_b = B
    else:
        tile_b = min(256, ((-(-B // 2) + 7) // 8) * 8)
    t_chunk = min(t_chunk, T)
    grid = (pl.cdiv(B, tile_b), pl.cdiv(T, t_chunk))

    out_dtype = emb_proj.dtype
    itm = jnp.dtype(out_dtype).itemsize
    # VMEM budget (v7x has only 64 MiB physical): double-buffered gi chunk +
    # resident W_hh^T / b_hh + h_scr + output block, with headroom.
    vmem_need = (2 * t_chunk * tile_b * 3 * H * gi_seq.dtype.itemsize
                 + 2 * (w_hh_t.size + b_hh2.size) * w_hh_t.dtype.itemsize
                 + tile_b * H * 4
                 + 2 * tile_b * H * itm)
    vmem_limit = int(min(64 * 2 ** 20, max(32 * 2 ** 20, 4 * vmem_need)))

    flops = 2 * B * T * H * (3 * H)           # only h @ W_hh^T is in-kernel
    bytes_accessed = (gi_seq.size * gi_seq.dtype.itemsize
                      + (w_hh_t.size + b_hh2.size) * w_hh_t.dtype.itemsize
                      + B * H * itm)

    kernel = functools.partial(_gru_chunk_kernel, T, t_chunk)

    out = pl.pallas_call(
        kernel,
        out_shape=jax.ShapeDtypeStruct((1, B, H), out_dtype),
        grid=grid,
        in_specs=[
            pl.BlockSpec((t_chunk, tile_b, 3 * H), lambda b, t: (t, b, 0)),
            pl.BlockSpec((H, 3 * H), lambda b, t: (0, 0)),   # W_hh^T (resident)
            pl.BlockSpec((1, 3 * H), lambda b, t: (0, 0)),   # b_hh   (resident)
        ],
        out_specs=pl.BlockSpec((1, tile_b, H), lambda b, t: (0, b, 0)),
        scratch_shapes=[pltpu.VMEM((tile_b, H), jnp.float32)],
        compiler_params=pltpu.CompilerParams(
            dimension_semantics=("parallel", "arbitrary"),
            vmem_limit_bytes=vmem_limit),
        cost_estimate=pl.CostEstimate(flops=flops,
                                      transcendentals=3 * B * T * H,
                                      bytes_accessed=bytes_accessed),
    )(gi_seq, w_hh_t, b_hh2)
    return out


def _reference(questions, emb_w, w_ih, w_hh, b_ih, b_hh):
    """Pure-JAX GRU reference (PyTorch gate order [r, z, n])."""
    Hh = w_hh.shape[1]
    x_seq = emb_w[jnp.transpose(questions)]            # (T, B, H)

    def step(h, x):
        gi = x @ w_ih.T + b_ih
        gh = h @ w_hh.T + b_hh
        r = jax.nn.sigmoid(gi[:, :Hh] + gh[:, :Hh])
        z = jax.nn.sigmoid(gi[:, Hh:2 * Hh] + gh[:, Hh:2 * Hh])
        n = jnp.tanh(gi[:, 2 * Hh:] + r * gh[:, 2 * Hh:])
        return (1.0 - z) * n + z * h, None

    h0 = jnp.zeros((questions.shape[0], Hh), dtype=emb_w.dtype)
    h_final, _ = jax.lax.scan(step, h0, x_seq)
    return h_final[None]                               # (1, B, H)


if __name__ == "__main__":
    # Small shapes consistent with the module: batch=4, seq=8, hidden=32, vocab=64.
    B, T, H, VOCAB = 4, 8, 32, 64
    key = jax.random.PRNGKey(0)
    k_q, k_e, k_wi, k_wh, k_bi, k_bh = jax.random.split(key, 6)

    questions = jax.random.randint(k_q, (B, T), 0, VOCAB, dtype=jnp.int32)
    emb_w = jax.random.normal(k_e, (VOCAB, H), dtype=jnp.float32)

    # nn.GRU(H, H) params: xavier_normal-style weights, uniform biases
    # (deterministic synthetic init; torch RNG parity not reproduced).
    xav = (2.0 / (H + H)) ** 0.5
    w_ih = xav * jax.random.normal(k_wi, (3 * H, H), dtype=jnp.float32)
    w_hh = xav * jax.random.normal(k_wh, (3 * H, H), dtype=jnp.float32)
    bound = 1.0 / (H ** 0.5)
    b_ih = jax.random.uniform(k_bi, (3 * H,), minval=-bound, maxval=bound,
                              dtype=jnp.float32)
    b_hh = jax.random.uniform(k_bh, (3 * H,), minval=-bound, maxval=bound,
                              dtype=jnp.float32)

    params = prepare_question_params(emb_w, w_ih, w_hh, b_ih, b_hh)

    out = question_module_forward(questions, params)
    out = jax.block_until_ready(out)

    ref = _reference(questions, emb_w, w_ih, w_hh, b_ih, b_hh)
    assert out.shape == (1, B, H)
    assert jnp.allclose(out, ref, atol=1e-3, rtol=1e-3), "mismatch vs reference"

    print("KERNEL_OK")
</pallas_src>

<mosaic_0001>
module attributes {stable_mosaic.version = 11 : i64} {
  func.func @_gru_chunk_kernel(%arg0: i32, %arg1: i32, %arg2: memref<8x4x96xf32, #tpu.memory_space<vmem>>, %arg3: memref<32x96xf32, #tpu.memory_space<vmem>>, %arg4: memref<1x96xf32, #tpu.memory_space<vmem>>, %arg5: memref<1x4x32xf32, #tpu.memory_space<vmem>>, %arg6: memref<4x32xf32, #tpu.memory_space<vmem>>) attributes {dimension_semantics = [#tpu.dimension_semantics<parallel>, #tpu.dimension_semantics<arbitrary>], iteration_bounds = array<i64: 1, 1>, scalar_prefetch = 0 : i64, scratch_operands = 1 : i64, tpu.core_type = #tpu.core_type<tc>, window_params = [{transform_indices = @transform_0, window_bounds = array<i64: 8, 4, 96>}, {pipeline_mode = #tpu.pipeline_mode<synchronous>, transform_indices = @transform_1, window_bounds = array<i64: 32, 96>}, {pipeline_mode = #tpu.pipeline_mode<synchronous>, transform_indices = @transform_2, window_bounds = array<i64: 1, 96>}, {transform_indices = @transform_3, window_bounds = array<i64: 1, 4, 32>}]} {
    %c0_i32 = arith.constant 0 : i32
    %0 = arith.cmpi eq, %arg1, %c0_i32 : i32
    %1 = arith.extui %0 : i1 to i32
    %c0_i32_0 = arith.constant 0 : i32
    %2 = arith.cmpi ne, %1, %c0_i32_0 : i32
    scf.if %2 {
      %cst_58 = arith.constant 0.000000e+00 : f32
      %260 = vector.broadcast %cst_58 : f32 to vector<4x32xf32>
      %c0_59 = arith.constant 0 : index
      %c0_60 = arith.constant 0 : index
      %261 = vector.load %arg6[%c0_59, %c0_60] : memref<4x32xf32, #tpu.memory_space<vmem>>, vector<4x32xf32>
      tpu.vector_store %arg6[%c0_59, %c0_60], %260 {strides = array<i32>} : memref<4x32xf32, #tpu.memory_space<vmem>>, vector<4x32xf32>,
    } else {
    }
    %c0 = arith.constant 0 : index
    %c0_1 = arith.constant 0 : index
    %3 = vector.load %arg3[%c0, %c0_1] : memref<32x96xf32, #tpu.memory_space<vmem>>, vector<32x96xf32>
    %c0_2 = arith.constant 0 : index
    %c0_3 = arith.constant 0 : index
    %4 = vector.load %arg4[%c0_2, %c0_3] : memref<1x96xf32, #tpu.memory_space<vmem>>, vector<1x96xf32>
    %5 = vector.shape_cast %4 : vector<1x96xf32> to vector<1x96xf32>
    %6 = vector.broadcast %5 : vector<1x96xf32> to vector<4x96xf32>
    %c0_4 = arith.constant 0 : index
    %c0_5 = arith.constant 0 : index
    %7 = vector.load %arg6[%c0_4, %c0_5] : memref<4x32xf32, #tpu.memory_space<vmem>>, vector<4x32xf32>
    %c0_i32_6 = arith.constant 0 : i32
    %8 = arith.index_cast %c0_i32_6 : i32 to index
    %c0_7 = arith.constant 0 : index
    %c0_8 = arith.constant 0 : index
    %9 = vector.load %arg2[%8, %c0_7, %c0_8] : memref<8x4x96xf32, #tpu.memory_space<vmem>>, vector<1x4x96xf32>
    %10 = vector.shape_cast %9 : vector<1x4x96xf32> to vector<4x96xf32>
    %cst = arith.constant dense<0.000000e+00> : vector<4x96xf32>
    %11 = tpu.matmul %7, %3, %cst {dimension_numbers = #tpu.dot_dimension_numbers<[1], [0], [0], [1], [0, 0, 1, 1], [], []>} : vector<4x32xf32>, vector<32x96xf32>, vector<4x96xf32> -> vector<4x96xf32>
    %12 = arith.addf %11, %6 : vector<4x96xf32>
    %13 = vector.extract_strided_slice %10 {offsets = [0, 0], sizes = [4, 32], strides = [1, 1]} : vector<4x96xf32> to vector<4x32xf32>
    %14 = vector.extract_strided_slice %12 {offsets = [0, 0], sizes = [4, 32], strides = [1, 1]} : vector<4x96xf32> to vector<4x32xf32>
    %15 = arith.addf %13, %14 : vector<4x32xf32>
    %16 = arith.negf %15 : vector<4x32xf32>
    %17 = math.exp %16 : vector<4x32xf32>
    %cst_9 = arith.constant 1.000000e+00 : f32
    %18 = vector.broadcast %cst_9 : f32 to vector<4x32xf32>
    %19 = arith.addf %18, %17 : vector<4x32xf32>
    %20 = arith.divf %18, %19 : vector<4x32xf32>
    %21 = vector.extract_strided_slice %10 {offsets = [0, 32], sizes = [4, 32], strides = [1, 1]} : vector<4x96xf32> to vector<4x32xf32>
    %22 = vector.extract_strided_slice %12 {offsets = [0, 32], sizes = [4, 32], strides = [1, 1]} : vector<4x96xf32> to vector<4x32xf32>
    %23 = arith.addf %21, %22 : vector<4x32xf32>
    %24 = arith.negf %23 : vector<4x32xf32>
    %25 = math.exp %24 : vector<4x32xf32>
    %cst_10 = arith.constant 1.000000e+00 : f32
    %26 = vector.broadcast %cst_10 : f32 to vector<4x32xf32>
    %27 = arith.addf %26, %25 : vector<4x32xf32>
    %28 = arith.divf %26, %27 : vector<4x32xf32>
    %29 = vector.extract_strided_slice %10 {offsets = [0, 64], sizes = [4, 32], strides = [1, 1]} : vector<4x96xf32> to vector<4x32xf32>
    %30 = vector.extract_strided_slice %12 {offsets = [0, 64], sizes = [4, 32], strides = [1, 1]} : vector<4x96xf32> to vector<4x32xf32>
    %31 = arith.mulf %20, %30 : vector<4x32xf32>
    %32 = arith.addf %29, %31 : vector<4x32xf32>
    %33 = math.tanh %32 : vector<4x32xf32>
    %cst_11 = arith.constant 1.000000e+00 : f32
    %34 = vector.broadcast %cst_11 : f32 to vector<4x32xf32>
    %35 = arith.subf %34, %28 : vector<4x32xf32>
    %36 = arith.mulf %35, %33 : vector<4x32xf32>
    %37 = arith.mulf %28, %7 : vector<4x32xf32>
    %38 = arith.addf %36, %37 : vector<4x32xf32>
    %c1_i32 = arith.constant 1 : i32
    %39 = arith.index_cast %c1_i32 : i32 to index
    %c0_12 = arith.constant 0 : index
    %c0_13 = arith.constant 0 : index
    %40 = vector.load %arg2[%39, %c0_12, %c0_13] : memref<8x4x96xf32, #tpu.memory_space<vmem>>, vector<1x4x96xf32>
    %41 = vector.shape_cast %40 : vector<1x4x96xf32> to vector<4x96xf32>
    %cst_14 = arith.constant dense<0.000000e+00> : vector<4x96xf32>
    %42 = tpu.matmul %38, %3, %cst_14 {dimension_numbers = #tpu.dot_dimension_numbers<[1], [0], [0], [1], [0, 0, 1, 1], [], []>} : vector<4x32xf32>, vector<32x96xf32>, vector<4x96xf32> -> vector<4x96xf32>
    %43 = arith.addf %42, %6 : vector<4x96xf32>
    %44 = vector.extract_strided_slice %41 {offsets = [0, 0], sizes = [4, 32], strides = [1, 1]} : vector<4x96xf32> to vector<4x32xf32>
    %45 = vector.extract_strided_slice %43 {offsets = [0, 0], sizes = [4, 32], strides = [1, 1]} : vector<4x96xf32> to vector<4x32xf32>
    %46 = arith.addf %44, %45 : vector<4x32xf32>
    %47 = arith.negf %46 : vector<4x32xf32>
    %48 = math.exp %47 : vector<4x32xf32>
    %cst_15 = arith.constant 1.000000e+00 : f32
    %49 = vector.broadcast %cst_15 : f32 to vector<4x32xf32>
    %50 = arith.addf %49, %48 : vector<4x32xf32>
    %51 = arith.divf %49, %50 : vector<4x32xf32>
    %52 = vector.extract_strided_slice %41 {offsets = [0, 32], sizes = [4, 32], strides = [1, 1]} : vector<4x96xf32> to vector<4x32xf32>
    %53 = vector.extract_strided_slice %43 {offsets = [0, 32], sizes = [4, 32], strides = [1, 1]} : vector<4x96xf32> to vector<4x32xf32>
    %54 = arith.addf %52, %53 : vector<4x32xf32>
    %55 = arith.negf %54 : vector<4x32xf32>
    %56 = math.exp %55 : vector<4x32xf32>
    %cst_16 = arith.constant 1.000000e+00 : f32
    %57 = vector.broadcast %cst_16 : f32 to vector<4x32xf32>
    %58 = arith.addf %57, %56 : vector<4x32xf32>
    %59 = arith.divf %57, %58 : vector<4x32xf32>
    %60 = vector.extract_strided_slice %41 {offsets = [0, 64], sizes = [4, 32], strides = [1, 1]} : vector<4x96xf32> to vector<4x32xf32>
    %61 = vector.extract_strided_slice %43 {offsets = [0, 64], sizes = [4, 32], strides = [1, 1]} : vector<4x96xf32> to vector<4x32xf32>
    %62 = arith.mulf %51, %61 : vector<4x32xf32>
    %63 = arith.addf %60, %62 : vector<4x32xf32>
    %64 = math.tanh %63 : vector<4x32xf32>
    %cst_17 = arith.constant 1.000000e+00 : f32
    %65 = vector.broadcast %cst_17 : f32 to vector<4x32xf32>
    %66 = arith.subf %65, %59 : vector<4x32xf32>
    %67 = arith.mulf %66, %64 : vector<4x32xf32>
    %68 = arith.mulf %59, %38 : vector<4x32xf32>
    %69 = arith.addf %67, %68 : vector<4x32xf32>
    %c2_i32 = arith.constant 2 : i32
    %70 = arith.index_cast %c2_i32 : i32 to index
    %c0_18 = arith.constant 0 : index
    %c0_19 = arith.constant 0 : index
    %71 = vector.load %arg2[%70, %c0_18, %c0_19] : memref<8x4x96xf32, #tpu.memory_space<vmem>>, vector<1x4x96xf32>
    %72 = vector.shape_cast %71 : vector<1x4x96xf32> to vector<4x96xf32>
    %cst_20 = arith.constant dense<0.000000e+00> : vector<4x96xf32>
    %73 = tpu.matmul %69, %3, %cst_20 {dimension_numbers = #tpu.dot_dimension_numbers<[1], [0], [0], [1], [0, 0, 1, 1], [], []>} : vector<4x32xf32>, vector<32x96xf32>, vector<4x96xf32> -> vector<4x96xf32>
    %74 = arith.addf %73, %6 : vector<4x96xf32>
    %75 = vector.extract_strided_slice %72 {offsets = [0, 0], sizes = [4, 32], strides = [1, 1]} : vector<4x96xf32> to vector<4x32xf32>
    %76 = vector.extract_strided_slice %74 {offsets = [0, 0], sizes = [4, 32], strides = [1, 1]} : vector<4x96xf32> to vector<4x32xf32>
    %77 = arith.addf %75, %76 : vector<4x32xf32>
    %78 = arith.negf %77 : vector<4x32xf32>
    %79 = math.exp %78 : vector<4x32xf32>
    %cst_21 = arith.constant 1.000000e+00 : f32
    %80 = vector.broadcast %cst_21 : f32 to vector<4x32xf32>
    %81 = arith.addf %80, %79 : vector<4x32xf32>
    %82 = arith.divf %80, %81 : vector<4x32xf32>
    %83 = vector.extract_strided_slice %72 {offsets = [0, 32], sizes = [4, 32], strides = [1, 1]} : vector<4x96xf32> to vector<4x32xf32>
    %84 = vector.extract_strided_slice %74 {offsets = [0, 32], sizes = [4, 32], strides = [1, 1]} : vector<4x96xf32> to vector<4x32xf32>
    %85 = arith.addf %83, %84 : vector<4x32xf32>
    %86 = arith.negf %85 : vector<4x32xf32>
    %87 = math.exp %86 : vector<4x32xf32>
    %cst_22 = arith.constant 1.000000e+00 : f32
    %88 = vector.broadcast %cst_22 : f32 to vector<4x32xf32>
    %89 = arith.addf %88, %87 : vector<4x32xf32>
    %90 = arith.divf %88, %89 : vector<4x32xf32>
    %91 = vector.extract_strided_slice %72 {offsets = [0, 64], sizes = [4, 32], strides = [1, 1]} : vector<4x96xf32> to vector<4x32xf32>
    %92 = vector.extract_strided_slice %74 {offsets = [0, 64], sizes = [4, 32], strides = [1, 1]} : vector<4x96xf32> to vector<4x32xf32>
    %93 = arith.mulf %82, %92 : vector<4x32xf32>
    %94 = arith.addf %91, %93 : vector<4x32xf32>
    %95 = math.tanh %94 : vector<4x32xf32>
    %cst_23 = arith.constant 1.000000e+00 : f32
    %96 = vector.broadcast %cst_23 : f32 to vector<4x32xf32>
    %97 = arith.subf %96, %90 : vector<4x32xf32>
    %98 = arith.mulf %97, %95 : vector<4x32xf32>
    %99 = arith.mulf %90, %69 : vector<4x32xf32>
    %100 = arith.addf %98, %99 : vector<4x32xf32>
    %c3_i32 = arith.constant 3 : i32
    %101 = arith.index_cast %c3_i32 : i32 to index
    %c0_24 = arith.constant 0 : index
    %c0_25 = arith.constant 0 : index
    %102 = vector.load %arg2[%101, %c0_24, %c0_25] : memref<8x4x96xf32, #tpu.memory_space<vmem>>, vector<1x4x96xf32>
    %103 = vector.shape_cast %102 : vector<1x4x96xf32> to vector<4x96xf32>
    %cst_26 = arith.constant dense<0.000000e+00> : vector<4x96xf32>
    %104 = tpu.matmul %100, %3, %cst_26 {dimension_numbers = #tpu.dot_dimension_numbers<[1], [0], [0], [1], [0, 0, 1, 1], [], []>} : vector<4x32xf32>, vector<32x96xf32>, vector<4x96xf32> -> vector<4x96xf32>
    %105 = arith.addf %104, %6 : vector<4x96xf32>
    %106 = vector.extract_strided_slice %103 {offsets = [0, 0], sizes = [4, 32], strides = [1, 1]} : vector<4x96xf32> to vector<4x32xf32>
    %107 = vector.extract_strided_slice %105 {offsets = [0, 0], sizes = [4, 32], strides = [1, 1]} : vector<4x96xf32> to vector<4x32xf32>
    %108 = arith.addf %106, %107 : vector<4x32xf32>
    %109 = arith.negf %108 : vector<4x32xf32>
    %110 = math.exp %109 : vector<4x32xf32>
    %cst_27 = arith.constant 1.000000e+00 : f32
    %111 = vector.broadcast %cst_27 : f32 to vector<4x32xf32>
    %112 = arith.addf %111, %110 : vector<4x32xf32>
    %113 = arith.divf %111, %112 : vector<4x32xf32>
    %114 = vector.extract_strided_slice %103 {offsets = [0, 32], sizes = [4, 32], strides = [1, 1]} : vector<4x96xf32> to vector<4x32xf32>
    %115 = vector.extract_strided_slice %105 {offsets = [0, 32], sizes = [4, 32], strides = [1, 1]} : vector<4x96xf32> to vector<4x32xf32>
    %116 = arith.addf %114, %115 : vector<4x32xf32>
    %117 = arith.negf %116 : vector<4x32xf32>
    %118 = math.exp %117 : vector<4x32xf32>
    %cst_28 = arith.constant 1.000000e+00 : f32
    %119 = vector.broadcast %cst_28 : f32 to vector<4x32xf32>
    %120 = arith.addf %119, %118 : vector<4x32xf32>
    %121 = arith.divf %119, %120 : vector<4x32xf32>
    %122 = vector.extract_strided_slice %103 {offsets = [0, 64], sizes = [4, 32], strides = [1, 1]} : vector<4x96xf32> to vector<4x32xf32>
    %123 = vector.extract_strided_slice %105 {offsets = [0, 64], sizes = [4, 32], strides = [1, 1]} : vector<4x96xf32> to vector<4x32xf32>
    %124 = arith.mulf %113, %123 : vector<4x32xf32>
    %125 = arith.addf %122, %124 : vector<4x32xf32>
    %126 = math.tanh %125 : vector<4x32xf32>
    %cst_29 = arith.constant 1.000000e+00 : f32
    %127 = vector.broadcast %cst_29 : f32 to vector<4x32xf32>
    %128 = arith.subf %127, %121 : vector<4x32xf32>
    %129 = arith.mulf %128, %126 : vector<4x32xf32>
    %130 = arith.mulf %121, %100 : vector<4x32xf32>
    %131 = arith.addf %129, %130 : vector<4x32xf32>
    %c4_i32 = arith.constant 4 : i32
    %132 = arith.index_cast %c4_i32 : i32 to index
    %c0_30 = arith.constant 0 : index
    %c0_31 = arith.constant 0 : index
    %133 = vector.load %arg2[%132, %c0_30, %c0_31] : memref<8x4x96xf32, #tpu.memory_space<vmem>>, vector<1x4x96xf32>
    %134 = vector.shape_cast %133 : vector<1x4x96xf32> to vector<4x96xf32>
    %cst_32 = arith.constant dense<0.000000e+00> : vector<4x96xf32>
    %135 = tpu.matmul %131, %3, %cst_32 {dimension_numbers = #tpu.dot_dimension_numbers<[1], [0], [0], [1], [0, 0, 1, 1], [], []>} : vector<4x32xf32>, vector<32x96xf32>, vector<4x96xf32> -> vector<4x96xf32>
    %136 = arith.addf %135, %6 : vector<4x96xf32>
    %137 = vector.extract_strided_slice %134 {offsets = [0, 0], sizes = [4, 32], strides = [1, 1]} : vector<4x96xf32> to vector<4x32xf32>
    %138 = vector.extract_strided_slice %136 {offsets = [0, 0], sizes = [4, 32], strides = [1, 1]} : vector<4x96xf32> to vector<4x32xf32>
    %139 = arith.addf %137, %138 : vector<4x32xf32>
    %140 = arith.negf %139 : vector<4x32xf32>
    %141 = math.exp %140 : vector<4x32xf32>
    %cst_33 = arith.constant 1.000000e+00 : f32
    %142 = vector.broadcast %cst_33 : f32 to vector<4x32xf32>
    %143 = arith.addf %142, %141 : vector<4x32xf32>
    %144 = arith.divf %142, %143 : vector<4x32xf32>
    %145 = vector.extract_strided_slice %134 {offsets = [0, 32], sizes = [4, 32], strides = [1, 1]} : vector<4x96xf32> to vector<4x32xf32>
    %146 = vector.extract_strided_slice %136 {offsets = [0, 32], sizes = [4, 32], strides = [1, 1]} : vector<4x96xf32> to vector<4x32xf32>
    %147 = arith.addf %145, %146 : vector<4x32xf32>
    %148 = arith.negf %147 : vector<4x32xf32>
    %149 = math.exp %148 : vector<4x32xf32>
    %cst_34 = arith.constant 1.000000e+00 : f32
    %150 = vector.broadcast %cst_34 : f32 to vector<4x32xf32>
    %151 = arith.addf %150, %149 : vector<4x32xf32>
    %152 = arith.divf %150, %151 : vector<4x32xf32>
    %153 = vector.extract_strided_slice %134 {offsets = [0, 64], sizes = [4, 32], strides = [1, 1]} : vector<4x96xf32> to vector<4x32xf32>
    %154 = vector.extract_strided_slice %136 {offsets = [0, 64], sizes = [4, 32], strides = [1, 1]} : vector<4x96xf32> to vector<4x32xf32>
    %155 = arith.mulf %144, %154 : vector<4x32xf32>
    %156 = arith.addf %153, %155 : vector<4x32xf32>
    %157 = math.tanh %156 : vector<4x32xf32>
    %cst_35 = arith.constant 1.000000e+00 : f32
    %158 = vector.broadcast %cst_35 : f32 to vector<4x32xf32>
    %159 = arith.subf %158, %152 : vector<4x32xf32>
    %160 = arith.mulf %159, %157 : vector<4x32xf32>
    %161 = arith.mulf %152, %131 : vector<4x32xf32>
    %162 = arith.addf %160, %161 : vector<4x32xf32>
    %c5_i32 = arith.constant 5 : i32
    %163 = arith.index_cast %c5_i32 : i32 to index
    %c0_36 = arith.constant 0 : index
    %c0_37 = arith.constant 0 : index
    %164 = vector.load %arg2[%163, %c0_36, %c0_37] : memref<8x4x96xf32, #tpu.memory_space<vmem>>, vector<1x4x96xf32>
    %165 = vector.shape_cast %164 : vector<1x4x96xf32> to vector<4x96xf32>
    %cst_38 = arith.constant dense<0.000000e+00> : vector<4x96xf32>
    %166 = tpu.matmul %162, %3, %cst_38 {dimension_numbers = #tpu.dot_dimension_numbers<[1], [0], [0], [1], [0, 0, 1, 1], [], []>} : vector<4x32xf32>, vector<32x96xf32>, vector<4x96xf32> -> vector<4x96xf32>
    %167 = arith.addf %166, %6 : vector<4x96xf32>
    %168 = vector.extract_strided_slice %165 {offsets = [0, 0], sizes = [4, 32], strides = [1, 1]} : vector<4x96xf32> to vector<4x32xf32>
    %169 = vector.extract_strided_slice %167 {offsets = [0, 0], sizes = [4, 32], strides = [1, 1]} : vector<4x96xf32> to vector<4x32xf32>
    %170 = arith.addf %168, %169 : vector<4x32xf32>
    %171 = arith.negf %170 : vector<4x32xf32>
    %172 = math.exp %171 : vector<4x32xf32>
    %cst_39 = arith.constant 1.000000e+00 : f32
    %173 = vector.broadcast %cst_39 : f32 to vector<4x32xf32>
    %174 = arith.addf %173, %172 : vector<4x32xf32>
    %175 = arith.divf %173, %174 : vector<4x32xf32>
    %176 = vector.extract_strided_slice %165 {offsets = [0, 32], sizes = [4, 32], strides = [1, 1]} : vector<4x96xf32> to vector<4x32xf32>
    %177 = vector.extract_strided_slice %167 {offsets = [0, 32], sizes = [4, 32], strides = [1, 1]} : vector<4x96xf32> to vector<4x32xf32>
    %178 = arith.addf %176, %177 : vector<4x32xf32>
    %179 = arith.negf %178 : vector<4x32xf32>
    %180 = math.exp %179 : vector<4x32xf32>
    %cst_40 = arith.constant 1.000000e+00 : f32
    %181 = vector.broadcast %cst_40 : f32 to vector<4x32xf32>
    %182 = arith.addf %181, %180 : vector<4x32xf32>
    %183 = arith.divf %181, %182 : vector<4x32xf32>
    %184 = vector.extract_strided_slice %165 {offsets = [0, 64], sizes = [4, 32], strides = [1, 1]} : vector<4x96xf32> to vector<4x32xf32>
    %185 = vector.extract_strided_slice %167 {offsets = [0, 64], sizes = [4, 32], strides = [1, 1]} : vector<4x96xf32> to vector<4x32xf32>
    %186 = arith.mulf %175, %185 : vector<4x32xf32>
    %187 = arith.addf %184, %186 : vector<4x32xf32>
    %188 = math.tanh %187 : vector<4x32xf32>
    %cst_41 = arith.constant 1.000000e+00 : f32
    %189 = vector.broadcast %cst_41 : f32 to vector<4x32xf32>
    %190 = arith.subf %189, %183 : vector<4x32xf32>
    %191 = arith.mulf %190, %188 : vector<4x32xf32>
    %192 = arith.mulf %183, %162 : vector<4x32xf32>
    %193 = arith.addf %191, %192 : vector<4x32xf32>
    %c6_i32 = arith.constant 6 : i32
    %194 = arith.index_cast %c6_i32 : i32 to index
    %c0_42 = arith.constant 0 : index
    %c0_43 = arith.constant 0 : index
    %195 = vector.load %arg2[%194, %c0_42, %c0_43] : memref<8x4x96xf32, #tpu.memory_space<vmem>>, vector<1x4x96xf32>
    %196 = vector.shape_cast %195 : vector<1x4x96xf32> to vector<4x96xf32>
    %cst_44 = arith.constant dense<0.000000e+00> : vector<4x96xf32>
    %197 = tpu.matmul %193, %3, %cst_44 {dimension_numbers = #tpu.dot_dimension_numbers<[1], [0], [0], [1], [0, 0, 1, 1], [], []>} : vector<4x32xf32>, vector<32x96xf32>, vector<4x96xf32> -> vector<4x96xf32>
    %198 = arith.addf %197, %6 : vector<4x96xf32>
    %199 = vector.extract_strided_slice %196 {offsets = [0, 0], sizes = [4, 32], strides = [1, 1]} : vector<4x96xf32> to vector<4x32xf32>
    %200 = vector.extract_strided_slice %198 {offsets = [0, 0], sizes = [4, 32], strides = [1, 1]} : vector<4x96xf32> to vector<4x32xf32>
    %201 = arith.addf %199, %200 : vector<4x32xf32>
    %202 = arith.negf %201 : vector<4x32xf32>
    %203 = math.exp %202 : vector<4x32xf32>
    %cst_45 = arith.constant 1.000000e+00 : f32
    %204 = vector.broadcast %cst_45 : f32 to vector<4x32xf32>
    %205 = arith.addf %204, %203 : vector<4x32xf32>
    %206 = arith.divf %204, %205 : vector<4x32xf32>
    %207 = vector.extract_strided_slice %196 {offsets = [0, 32], sizes = [4, 32], strides = [1, 1]} : vector<4x96xf32> to vector<4x32xf32>
    %208 = vector.extract_strided_slice %198 {offsets = [0, 32], sizes = [4, 32], strides = [1, 1]} : vector<4x96xf32> to vector<4x32xf32>
    %209 = arith.addf %207, %208 : vector<4x32xf32>
    %210 = arith.negf %209 : vector<4x32xf32>
    %211 = math.exp %210 : vector<4x32xf32>
    %cst_46 = arith.constant 1.000000e+00 : f32
    %212 = vector.broadcast %cst_46 : f32 to vector<4x32xf32>
    %213 = arith.addf %212, %211 : vector<4x32xf32>
    %214 = arith.divf %212, %213 : vector<4x32xf32>
    %215 = vector.extract_strided_slice %196 {offsets = [0, 64], sizes = [4, 32], strides = [1, 1]} : vector<4x96xf32> to vector<4x32xf32>
    %216 = vector.extract_strided_slice %198 {offsets = [0, 64], sizes = [4, 32], strides = [1, 1]} : vector<4x96xf32> to vector<4x32xf32>
    %217 = arith.mulf %206, %216 : vector<4x32xf32>
    %218 = arith.addf %215, %217 : vector<4x32xf32>
    %219 = math.tanh %218 : vector<4x32xf32>
    %cst_47 = arith.constant 1.000000e+00 : f32
    %220 = vector.broadcast %cst_47 : f32 to vector<4x32xf32>
    %221 = arith.subf %220, %214 : vector<4x32xf32>
    %222 = arith.mulf %221, %219 : vector<4x32xf32>
    %223 = arith.mulf %214, %193 : vector<4x32xf32>
    %224 = arith.addf %222, %223 : vector<4x32xf32>
    %c7_i32 = arith.constant 7 : i32
    %225 = arith.index_cast %c7_i32 : i32 to index
    %c0_48 = arith.constant 0 : index
    %c0_49 = arith.constant 0 : index
    %226 = vector.load %arg2[%225, %c0_48, %c0_49] : memref<8x4x96xf32, #tpu.memory_space<vmem>>, vector<1x4x96xf32>
    %227 = vector.shape_cast %226 : vector<1x4x96xf32> to vector<4x96xf32>
    %cst_50 = arith.constant dense<0.000000e+00> : vector<4x96xf32>
    %228 = tpu.matmul %224, %3, %cst_50 {dimension_numbers = #tpu.dot_dimension_numbers<[1], [0], [0], [1], [0, 0, 1, 1], [], []>} : vector<4x32xf32>, vector<32x96xf32>, vector<4x96xf32> -> vector<4x96xf32>
    %229 = arith.addf %228, %6 : vector<4x96xf32>
    %230 = vector.extract_strided_slice %227 {offsets = [0, 0], sizes = [4, 32], strides = [1, 1]} : vector<4x96xf32> to vector<4x32xf32>
    %231 = vector.extract_strided_slice %229 {offsets = [0, 0], sizes = [4, 32], strides = [1, 1]} : vector<4x96xf32> to vector<4x32xf32>
    %232 = arith.addf %230, %231 : vector<4x32xf32>
    %233 = arith.negf %232 : vector<4x32xf32>
    %234 = math.exp %233 : vector<4x32xf32>
    %cst_51 = arith.constant 1.000000e+00 : f32
    %235 = vector.broadcast %cst_51 : f32 to vector<4x32xf32>
    %236 = arith.addf %235, %234 : vector<4x32xf32>
    %237 = arith.divf %235, %236 : vector<4x32xf32>
    %238 = vector.extract_strided_slice %227 {offsets = [0, 32], sizes = [4, 32], strides = [1, 1]} : vector<4x96xf32> to vector<4x32xf32>
    %239 = vector.extract_strided_slice %229 {offsets = [0, 32], sizes = [4, 32], strides = [1, 1]} : vector<4x96xf32> to vector<4x32xf32>
    %240 = arith.addf %238, %239 : vector<4x32xf32>
    %241 = arith.negf %240 : vector<4x32xf32>
    %242 = math.exp %241 : vector<4x32xf32>
    %cst_52 = arith.constant 1.000000e+00 : f32
    %243 = vector.broadcast %cst_52 : f32 to vector<4x32xf32>
    %244 = arith.addf %243, %242 : vector<4x32xf32>
    %245 = arith.divf %243, %244 : vector<4x32xf32>
    %246 = vector.extract_strided_slice %227 {offsets = [0, 64], sizes = [4, 32], strides = [1, 1]} : vector<4x96xf32> to vector<4x32xf32>
    %247 = vector.extract_strided_slice %229 {offsets = [0, 64], sizes = [4, 32], strides = [1, 1]} : vector<4x96xf32> to vector<4x32xf32>
    %248 = arith.mulf %237, %247 : vector<4x32xf32>
    %249 = arith.addf %246, %248 : vector<4x32xf32>
    %250 = math.tanh %249 : vector<4x32xf32>
    %cst_53 = arith.constant 1.000000e+00 : f32
    %251 = vector.broadcast %cst_53 : f32 to vector<4x32xf32>
    %252 = arith.subf %251, %245 : vector<4x32xf32>
    %253 = arith.mulf %252, %250 : vector<4x32xf32>
    %254 = arith.mulf %245, %224 : vector<4x32xf32>
    %255 = arith.addf %253, %254 : vector<4x32xf32>
    %c8_i32 = arith.constant 8 : i32
    %c0_54 = arith.constant 0 : index
    %c0_55 = arith.constant 0 : index
    %256 = vector.load %arg6[%c0_54, %c0_55] : memref<4x32xf32, #tpu.memory_space<vmem>>, vector<4x32xf32>
    tpu.vector_store %arg6[%c0_54, %c0_55], %255 {strides = array<i32>} : memref<4x32xf32, #tpu.memory_space<vmem>>, vector<4x32xf32>,
    %c0_i32_56 = arith.constant 0 : i32
    %257 = arith.cmpi eq, %arg1, %c0_i32_56 : i32
    %258 = arith.extui %257 : i1 to i32
    %c0_i32_57 = arith.constant 0 : i32
    %259 = arith.cmpi ne, %258, %c0_i32_57 : i32
    scf.if %259 {
      %c0_58 = arith.constant 0 : index
      %c0_59 = arith.constant 0 : index
      %c0_60 = arith.constant 0 : index
      %260 = vector.load %arg5[%c0_58, %c0_59, %c0_60] : memref<1x4x32xf32, #tpu.memory_space<vmem>>, vector<1x4x32xf32>
      %261 = vector.shape_cast %260 : vector<1x4x32xf32> to vector<4x32xf32>
      %262 = vector.shape_cast %255 : vector<4x32xf32> to vector<1x4x32xf32>
      tpu.vector_store %arg5[%c0_58, %c0_59, %c0_60], %262 {strides = array<i32>} : memref<1x4x32xf32, #tpu.memory_space<vmem>>, vector<1x4x32xf32>,
    } else {
    }
    return
  }
  func.func @transform_0(%arg0: i32, %arg1: i32) -> (i32, i32, i32) {
    %c0_i32 = arith.constant 0 : i32
    %c0_i32_0 = arith.constant 0 : i32
    return %arg1, %arg0, %c0_i32 : i32, i32, i32
  }
  func.func @transform_1(%arg0: i32, %arg1: i32) -> (i32, i32) {
    %c0_i32 = arith.constant 0 : i32
    %c0_i32_0 = arith.constant 0 : i32
    %c0_i32_1 = arith.constant 0 : i32
    return %c0_i32, %c0_i32_0 : i32, i32
  }
  func.func @transform_2(%arg0: i32, %arg1: i32) -> (i32, i32) {
    %c0_i32 = arith.constant 0 : i32
    %c0_i32_0 = arith.constant 0 : i32
    %c0_i32_1 = arith.constant 0 : i32
    return %c0_i32, %c0_i32_0 : i32, i32
  }
  func.func @transform_3(%arg0: i32, %arg1: i32) -> (i32, i32, i32) {
    %c0_i32 = arith.constant 0 : i32
    %c0_i32_0 = arith.constant 0 : i32
    %c0_i32_1 = arith.constant 0 : i32
    return %c0_i32, %arg0, %c0_i32_0 : i32, i32, i32
  }
}

</mosaic_0001>

<bundles_post_ra>
// kernel: tpu_custom_call.1
= control target key start
LH: loop header
LB: loop body
LE: loop exit
PB: predicated region body
PF: predicated region fallthrough
CT: control target
= control target key end

     0   :  { %8 = vsyncpa [#allocation4], 0  ;;  %s869_s0 = inlined_call_operand.hbm [shape: f32[8,4,96], index: 0, kind: input, shape index: {}]   ;;  %s870_s1 = inlined_call_operand.hbm [shape: f32[32,96], index: 1, kind: input, shape index: {}]   ;;  %s871_s2 = inlined_call_operand.vmem [shape: f32[1,96], index: 2, kind: input, shape index: {}]   ;;  %s872_s3 = inlined_call_operand.hbm [shape: f32[1,4,32], index: 3, kind: output, shape index: {}]  }
   0x1   :  { %9 = vsyncpa [#allocation7], 0 }
   0x2   :  { %10 = vsyncpa [#allocation5], 0  ;;  %s15_s14 = sshll.u32 %s869_s0, 4  ;;  %s772_s15 = smov [#allocation3]   ;;  %s16_s14 = int_to_ptr.hbm [resolvable:$true] %s15_s14 }
   0x3   :  { %s17_s16 = sshll.u32 %s772_s15, 4  ;;  %s28_s19 = sshll.u32 %s870_s1, 4  ;;  %s18_s16 = int_to_ptr.vmem [resolvable:$true] %s17_s16  ;;  %s29_s19 = int_to_ptr.hbm [resolvable:$true] %s28_s19 }
   0x4   :  { %s773_s20 = smov 64   ;;  %s774_s21 = smov 4  }
   0x5   :  { %23 = dma.hbm_to_vmem [thread:$0]  %s16_s14, 512, %s18_s16, [#allocation4], %s773_s20, %s773_s20, %s774_s21  }
   0x6   :  { %s775_s22 = smov [#allocation6]   ;;  %s776_s24 = smov 128  }
   0x7   :  { %s30_s23 = sshll.u32 %s775_s22, 4  ;;  %s777_s25 = smov 8   ;;  %s31_s23 = int_to_ptr.vmem [resolvable:$true] %s30_s23 }
   0x8   :  { %36 = dma.hbm_to_vmem [thread:$0]  %s29_s19, 512, %s31_s23, [#allocation7], %s776_s24, %s776_s24, %s777_s25  }
   0x9   :  { %766 = dma.done.wait [#allocation4], 512  }
   0xa   :  { %767 = vsyncadd [#allocation4], 4294966784 }
   0xb   :  { %768 = dma.done.wait [#allocation7], 512  }
   0xc   :  { %769 = vsyncadd [#allocation7], 4294966784  ;;  %vm51_vm0 = vcmask 257024   ;;  %v778_v0 = vmov 0.0   ;;  %v56_v1 = vld [vmem:[#allocation6 + $0x18] sm:$0xff]  ;;  %v55_v2 = vld [vmem:[#allocation6 + $0x10] sm:$0xff] }
   0xd   :  { %52 = vst.msk [vmem:[#allocation2] sm:$0xf] %vm51_vm0, %v778_v0  ;;  %79 = vmatpush.msra.mxu0 %v56_v1  ;;  %148 = vmatpush.msra.mxu1 %v56_v1  ;;  %v54_v3 = vld [vmem:[#allocation6 + $0x8] sm:$0xff]  ;;  %v53_v4 = vld [vmem:[#allocation6] sm:$0xff]  ;;  %vm63_vm1 = vcmask 261120   ;;  %s780_s26 = smov 32  }
   0xe   :  { %214 = vmatpush.msra.mxu2 %v56_v1  ;;  %280 = vmatpush.msra.mxu3 %v56_v1  ;;  %v815_v6 = vld [vmem:[%s871_s2] ss:$0 sm:$0xff]  ;;  %v62_v9 = vld [vmem:[#allocation3] sm:$0xf]  ;;  %s779_s2 = smov 96   ;;  %s781_s27 = smov [#allocation8]  }
   0xf   :  { %80 = vmatpush.msra.mxu0 %v55_v2  ;;  %149 = vmatpush.msra.mxu1 %v55_v2  ;;  %v130_v38 = vld [vmem:[#allocation3 + $0x4] sm:$0xf]  ;;  %s606_s28 = sshll.u32 %s781_s27, 4  ;;  %s608_s4 = sshll.u32 %s872_s3, 4  ;;  %s607_s28 = int_to_ptr.vmem [resolvable:$true] %s606_s28  ;;  %s609_s4 = int_to_ptr.hbm [resolvable:$true] %s608_s4 }
  0x10   :  { %215 = vmatpush.msra.mxu2 %v55_v2  ;;  %281 = vmatpush.msra.mxu3 %v55_v2 }
  0x11   :  { %81 = vmatpush.msra.mxu0 %v54_v3  ;;  %150 = vmatpush.msra.mxu1 %v54_v3 }
  0x12   :  { %216 = vmatpush.msra.mxu2 %v54_v3  ;;  %282 = vmatpush.msra.mxu3 %v54_v3 }
  0x13   :  { %82 = vmatpush.msra.mxu0 %v53_v4  ;;  %151 = vmatpush.msra.mxu1 %v53_v4 }
  0x14   :  { %v61_v5 = vld [vmem:[#allocation2] sm:$0xf]  ;;  %217 = vmatpush.msra.mxu2 %v53_v4  ;;  %283 = vmatpush.msra.mxu3 %v53_v4 }
  0x15   :  { %619 = vmatmul.msk.f32.vlgmr.msra.gmra.mxu0 %vm63_vm1, %v61_v5  ;;  %412 = vmatpush.msrb.mxu1 %v56_v1 }
  0x16   :  { %346 = vmatpush.msrb.mxu0 %v56_v1  ;;  %478 = vmatpush.msrb.mxu2 %v56_v1 }
  0x17   :  { %544 = vmatpush.msrb.mxu3 %v56_v1  ;;  %413 = vmatpush.msrb.mxu1 %v55_v2 }
  0x18   :  { %347 = vmatpush.msrb.mxu0 %v55_v2  ;;  %479 = vmatpush.msrb.mxu2 %v55_v2 }
  0x19   :  { %545 = vmatpush.msrb.mxu3 %v55_v2  ;;  %414 = vmatpush.msrb.mxu1 %v54_v3  ;;  %v196_v2 = vld [vmem:[#allocation3 + $0x8] sm:$0xf] }
  0x1a   :  { %348 = vmatpush.msrb.mxu0 %v54_v3  ;;  %480 = vmatpush.msrb.mxu2 %v54_v3 }
  0x1b   :  { %546 = vmatpush.msrb.mxu3 %v54_v3  ;;  %415 = vmatpush.msrb.mxu1 %v53_v4 }
  0x1c   :  { %349 = vmatpush.msrb.mxu0 %v53_v4  ;;  %481 = vmatpush.msrb.mxu2 %v53_v4 }
  0x1d   :  { %547 = vmatpush.msrb.mxu3 %v53_v4 }
  0x92   :  { %v84_v7 = vpop.f32.mrf.mxu0 }
  0x93   :  { %v85_v8 = vadd.f32 %v815_v6, %v84_v7 }
  0x95   :  { %108 = vrot.lane.b32.xlu0 %v85_v8, %s773_s20  ;;  %v87_v10 = vadd.f32 %v85_v8, %v62_v9 }
  0x97   :  { %v620_v11 = vmul.f32 -1.442695, %v87_v10 }
  0x99   :  { %646 = vpow2.f32 %v620_v11 }
  0x9f   :  { %v647_v12 = vpop.eup %646 }
  0xa0   :  { %v91_v13 = vadd.f32 1.0, %v647_v12 }
  0xa2   :  { %648 = vrcp.f32 %v91_v13  ;;  %v103_v19 = vand.u32 2147483648, %v91_v13  ;;  %vm97_vm3 = vweird.f32 %v91_v13  ;;  %v101_v20 = vand.u32 2147483647, %v91_v13 }
  0xa4   :  { %v104_v22 = vor.u32 1.1754944e-38, %v103_v19  ;;  %vm102_vm5 = vcmp.eq.f32.partialorder %v101_v20, 8.507059e+37 }
  0xa8   :  { %v649_v14 = vpop.eup %648 }
  0xa9   :  { %v93_v15 = vmul.f32 %v649_v14, %v91_v13  ;;  %vm98_vm2 = vweird.f32 %v649_v14 }
  0xaa   :  { %vm99_vm4 = vmor %vm97_vm3, %vm98_vm2 }
  0xab   :  { %v94_v16 = vsub.f32 1.0, %v93_v15 }
  0xad   :  { %v95_v17 = vmul.f32 %v649_v14, %v94_v16 }
  0xaf   :  { %v96_v18 = vadd.f32 %v649_v14, %v95_v17 }
  0xb1   :  { %v100_v21 = vsel %vm99_vm4, %v649_v14, %v96_v18 }
  0xb2   :  { %v105_v24 = vsel %vm102_vm5, %v104_v22, %v100_v21 }
  0xb3   :  { %v118_v30 = vsub.f32 1.0, %v105_v24 }
 0x107   :  { %v109_v23 = vpop.permute.xlu0 %108 }
 0x108   :  { %v111_v25 = vmul.f32 %v109_v23, %v105_v24 }
 0x10a   :  { %113 = vrot.lane.b32.xlu0 %v111_v25, %s773_s20 }
 0x17c   :  { %v114_v26 = vpop.permute.xlu0 %113 }
 0x17d   :  { %v116_v27 = vadd.f32 %v114_v26, %v62_v9 }
 0x17f   :  { %650 = vtanh.f32 %v116_v27 }
 0x185   :  { %v651_v28 = vpop.eup %650 }
 0x186   :  { %120 = vrot.lane.b32.xlu1 %v651_v28, %s779_s2 }
 0x18e   :  { %124 = vrot.lane.b32.xlu1 %v61_v5, %s780_s26 }
 0x1f8   :  { %v121_v29 = vpop.permute.xlu1 %120 }
 0x1f9   :  { %v123_v32 = vmul.f32 %v121_v29, %v118_v30 }
 0x200   :  { %v125_v31 = vpop.permute.xlu1 %124 }
 0x201   :  { %v127_v33 = vmul.f32 %v125_v31, %v105_v24  ;;  %v262_v31 = vld [vmem:[#allocation3 + $0xc] sm:$0xf] }
 0x203   :  { %v128_v34 = vadd.f32 %v127_v33, %v123_v32 }
 0x205   :  { %132 = vrot.lane.b32.xlu2 %v128_v34, %s779_s2 }
 0x25f   :  { %v133_v35 = vpop.permute.xlu2 %132 }
 0x260   :  { %621 = vmatmul.msk.f32.vlgmr.msra.gmra.mxu1 %vm63_vm1, %v133_v35 }
 0x2dd   :  { %v153_v36 = vpop.f32.mrf.mxu1 }
 0x2de   :  { %v154_v37 = vadd.f32 %v815_v6, %v153_v36 }
 0x2e0   :  { %177 = vrot.lane.b32.xlu2 %v154_v37, %s773_s20  ;;  %v156_v39 = vadd.f32 %v154_v37, %v130_v38 }
 0x2e2   :  { %v622_v40 = vmul.f32 -1.442695, %v156_v39 }
 0x2e4   :  { %652 = vpow2.f32 %v622_v40 }
 0x2ea   :  { %v653_v41 = vpop.eup %652 }
 0x2eb   :  { %v160_v42 = vadd.f32 1.0, %v653_v41 }
 0x2ed   :  { %654 = vrcp.f32 %v160_v42  ;;  %v172_v48 = vand.u32 2147483648, %v160_v42  ;;  %vm166_vm7 = vweird.f32 %v160_v42  ;;  %v170_v49 = vand.u32 2147483647, %v160_v42 }
 0x2ef   :  { %v173_v51 = vor.u32 1.1754944e-38, %v172_v48  ;;  %vm171_vm9 = vcmp.eq.f32.partialorder %v170_v49, 8.507059e+37 }
 0x2f3   :  { %v655_v43 = vpop.eup %654 }
 0x2f4   :  { %v162_v44 = vmul.f32 %v655_v43, %v160_v42  ;;  %vm167_vm6 = vweird.f32 %v655_v43 }
 0x2f5   :  { %vm168_vm8 = vmor %vm166_vm7, %vm167_vm6 }
 0x2f6   :  { %v163_v45 = vsub.f32 1.0, %v162_v44 }
 0x2f8   :  { %v164_v46 = vmul.f32 %v655_v43, %v163_v45 }
 0x2fa   :  { %v165_v47 = vadd.f32 %v655_v43, %v164_v46 }
 0x2fc   :  { %v169_v50 = vsel %vm168_vm8, %v655_v43, %v165_v47 }
 0x2fd   :  { %v174_v53 = vsel %vm171_vm9, %v173_v51, %v169_v50 }
 0x2fe   :  { %v187_v58 = vsub.f32 1.0, %v174_v53  ;;  %v193_v60 = vmul.f32 %v174_v53, %v128_v34 }
 0x33a   :  { %v178_v52 = vpop.permute.xlu2 %177 }
 0x33b   :  { %v180_v54 = vmul.f32 %v178_v52, %v174_v53 }
 0x33d   :  { %182 = vrot.lane.b32.xlu0 %v180_v54, %s773_s20 }
 0x3af   :  { %v183_v55 = vpop.permute.xlu0 %182 }
 0x3b0   :  { %v185_v56 = vadd.f32 %v183_v55, %v130_v38 }
 0x3b2   :  { %656 = vtanh.f32 %v185_v56 }
 0x3b8   :  { %v657_v57 = vpop.eup %656 }
 0x3b9   :  { %189 = vrot.lane.b32.xlu1 %v657_v57, %s779_s2 }
 0x42b   :  { %v190_v59 = vpop.permute.xlu1 %189 }
 0x42c   :  { %v192_v61 = vmul.f32 %v190_v59, %v187_v58  ;;  %v328_v59 = vld [vmem:[#allocation3 + $0x10] sm:$0xf] }
 0x42e   :  { %v194_v62 = vadd.f32 %v193_v60, %v192_v61 }
 0x430   :  { %198 = vrot.lane.b32.xlu2 %v194_v62, %s779_s2 }
 0x48a   :  { %v199_v63 = vpop.permute.xlu2 %198 }
 0x48b   :  { %623 = vmatmul.msk.f32.vlgmr.msra.gmra.mxu2 %vm63_vm1, %v199_v63 }
 0x50e   :  { %v219_v0 = vpop.f32.mrf.mxu2 }
 0x50f   :  { %v220_v1 = vadd.f32 %v815_v6, %v219_v0 }
 0x511   :  { %243 = vrot.lane.b32.xlu0 %v220_v1, %s773_s20  ;;  %v222_v3 = vadd.f32 %v220_v1, %v196_v2 }
 0x513   :  { %v624_v4 = vmul.f32 -1.442695, %v222_v3 }
 0x515   :  { %658 = vpow2.f32 %v624_v4 }
 0x51b   :  { %v659_v5 = vpop.eup %658 }
 0x51c   :  { %v226_v7 = vadd.f32 1.0, %v659_v5 }
 0x51e   :  { %660 = vrcp.f32 %v226_v7  ;;  %v238_v13 = vand.u32 2147483648, %v226_v7  ;;  %vm232_vm11 = vweird.f32 %v226_v7  ;;  %v236_v14 = vand.u32 2147483647, %v226_v7 }
 0x520   :  { %v239_v16 = vor.u32 1.1754944e-38, %v238_v13  ;;  %vm237_vm13 = vcmp.eq.f32.partialorder %v236_v14, 8.507059e+37 }
 0x524   :  { %v661_v8 = vpop.eup %660 }
 0x525   :  { %v228_v9 = vmul.f32 %v661_v8, %v226_v7  ;;  %vm233_vm10 = vweird.f32 %v661_v8 }
 0x526   :  { %vm234_vm12 = vmor %vm232_vm11, %vm233_vm10 }
 0x527   :  { %v229_v10 = vsub.f32 1.0, %v228_v9 }
 0x529   :  { %v230_v11 = vmul.f32 %v661_v8, %v229_v10 }
 0x52b   :  { %v231_v12 = vadd.f32 %v661_v8, %v230_v11 }
 0x52d   :  { %v235_v15 = vsel %vm234_vm12, %v661_v8, %v231_v12 }
 0x52e   :  { %v240_v18 = vsel %vm237_vm13, %v239_v16, %v235_v15 }
 0x52f   :  { %v253_v23 = vsub.f32 1.0, %v240_v18  ;;  %v259_v25 = vmul.f32 %v240_v18, %v194_v62 }
 0x583   :  { %v244_v17 = vpop.permute.xlu0 %243 }
 0x584   :  { %v246_v19 = vmul.f32 %v244_v17, %v240_v18 }
 0x586   :  { %248 = vrot.lane.b32.xlu1 %v246_v19, %s773_s20 }
 0x5f8   :  { %v249_v20 = vpop.permute.xlu1 %248 }
 0x5f9   :  { %v251_v21 = vadd.f32 %v249_v20, %v196_v2 }
 0x5fb   :  { %662 = vtanh.f32 %v251_v21 }
 0x601   :  { %v663_v22 = vpop.eup %662 }
 0x602   :  { %255 = vrot.lane.b32.xlu2 %v663_v22, %s779_s2 }
 0x65c   :  { %v256_v24 = vpop.permute.xlu2 %255 }
 0x65d   :  { %v258_v26 = vmul.f32 %v256_v24, %v253_v23  ;;  %v394_v24 = vld [vmem:[#allocation3 + $0x14] sm:$0xf] }
 0x65f   :  { %v260_v27 = vadd.f32 %v259_v25, %v258_v26 }
 0x661   :  { %264 = vrot.lane.b32.xlu0 %v260_v27, %s779_s2 }
 0x6d3   :  { %v265_v28 = vpop.permute.xlu0 %264 }
 0x6d4   :  { %625 = vmatmul.msk.f32.vlgmr.msra.gmra.mxu3 %vm63_vm1, %v265_v28 }
 0x757   :  { %v285_v29 = vpop.f32.mrf.mxu3 }
 0x758   :  { %v286_v30 = vadd.f32 %v815_v6, %v285_v29 }
 0x75a   :  { %309 = vrot.lane.b32.xlu1 %v286_v30, %s773_s20  ;;  %v288_v32 = vadd.f32 %v286_v30, %v262_v31 }
 0x75c   :  { %v626_v33 = vmul.f32 -1.442695, %v288_v32 }
 0x75e   :  { %664 = vpow2.f32 %v626_v33 }
 0x764   :  { %v665_v34 = vpop.eup %664 }
 0x765   :  { %v292_v35 = vadd.f32 1.0, %v665_v34 }
 0x767   :  { %666 = vrcp.f32 %v292_v35  ;;  %v304_v41 = vand.u32 2147483648, %v292_v35  ;;  %vm298_vm15 = vweird.f32 %v292_v35  ;;  %v302_v42 = vand.u32 2147483647, %v292_v35 }
 0x769   :  { %v305_v44 = vor.u32 1.1754944e-38, %v304_v41  ;;  %vm303_vm3 = vcmp.eq.f32.partialorder %v302_v42, 8.507059e+37 }
 0x76d   :  { %v667_v36 = vpop.eup %666 }
 0x76e   :  { %v294_v37 = vmul.f32 %v667_v36, %v292_v35  ;;  %vm299_vm14 = vweird.f32 %v667_v36 }
 0x76f   :  { %vm300_vm2 = vmor %vm298_vm15, %vm299_vm14 }
 0x770   :  { %v295_v38 = vsub.f32 1.0, %v294_v37 }
 0x772   :  { %v296_v39 = vmul.f32 %v667_v36, %v295_v38 }
 0x774   :  { %v297_v40 = vadd.f32 %v667_v36, %v296_v39 }
 0x776   :  { %v301_v43 = vsel %vm300_vm2, %v667_v36, %v297_v40 }
 0x777   :  { %v306_v46 = vsel %vm303_vm3, %v305_v44, %v301_v43 }
 0x778   :  { %v319_v51 = vsub.f32 1.0, %v306_v46  ;;  %v325_v53 = vmul.f32 %v306_v46, %v260_v27 }
 0x7cc   :  { %v310_v45 = vpop.permute.xlu1 %309 }
 0x7cd   :  { %v312_v47 = vmul.f32 %v310_v45, %v306_v46 }
 0x7cf   :  { %314 = vrot.lane.b32.xlu2 %v312_v47, %s773_s20 }
 0x829   :  { %v315_v48 = vpop.permute.xlu2 %314 }
 0x82a   :  { %v317_v49 = vadd.f32 %v315_v48, %v262_v31 }
 0x82c   :  { %668 = vtanh.f32 %v317_v49 }
 0x832   :  { %v669_v50 = vpop.eup %668 }
 0x833   :  { %321 = vrot.lane.b32.xlu0 %v669_v50, %s779_s2 }
 0x8a5   :  { %v322_v52 = vpop.permute.xlu0 %321 }
 0x8a6   :  { %v324_v54 = vmul.f32 %v322_v52, %v319_v51  ;;  %v460_v52 = vld [vmem:[#allocation3 + $0x18] sm:$0xf] }
 0x8a8   :  { %v326_v55 = vadd.f32 %v325_v53, %v324_v54 }
 0x8aa   :  { %330 = vrot.lane.b32.xlu1 %v326_v55, %s779_s2 }
 0x91c   :  { %v331_v56 = vpop.permute.xlu1 %330 }
 0x91d   :  { %627 = vmatmul.msk.f32.vlgmr.msrb.gmra.mxu0 %vm63_vm1, %v331_v56 }
 0x99a   :  { %v351_v57 = vpop.f32.mrf.mxu0 }
 0x99b   :  { %v352_v58 = vadd.f32 %v815_v6, %v351_v57 }
 0x99d   :  { %375 = vrot.lane.b32.xlu2 %v352_v58, %s773_s20  ;;  %v354_v60 = vadd.f32 %v352_v58, %v328_v59 }
 0x99f   :  { %v628_v61 = vmul.f32 -1.442695, %v354_v60 }
 0x9a1   :  { %670 = vpow2.f32 %v628_v61 }
 0x9a7   :  { %v671_v62 = vpop.eup %670 }
 0x9a8   :  { %v358_v63 = vadd.f32 1.0, %v671_v62 }
 0x9aa   :  { %672 = vrcp.f32 %v358_v63  ;;  %v370_v5 = vand.u32 2147483648, %v358_v63  ;;  %vm364_vm5 = vweird.f32 %v358_v63  ;;  %v368_v7 = vand.u32 2147483647, %v358_v63 }
 0x9ac   :  { %v371_v9 = vor.u32 1.1754944e-38, %v370_v5  ;;  %vm369_vm7 = vcmp.eq.f32.partialorder %v368_v7, 8.507059e+37 }
 0x9b0   :  { %v673_v0 = vpop.eup %672 }
 0x9b1   :  { %v360_v1 = vmul.f32 %v673_v0, %v358_v63  ;;  %vm365_vm4 = vweird.f32 %v673_v0 }
 0x9b2   :  { %vm366_vm6 = vmor %vm364_vm5, %vm365_vm4 }
 0x9b3   :  { %v361_v2 = vsub.f32 1.0, %v360_v1 }
 0x9b5   :  { %v362_v3 = vmul.f32 %v673_v0, %v361_v2 }
 0x9b7   :  { %v363_v4 = vadd.f32 %v673_v0, %v362_v3 }
 0x9b9   :  { %v367_v8 = vsel %vm366_vm6, %v673_v0, %v363_v4 }
 0x9ba   :  { %v372_v11 = vsel %vm369_vm7, %v371_v9, %v367_v8 }
 0x9bb   :  { %v385_v16 = vsub.f32 1.0, %v372_v11  ;;  %v391_v18 = vmul.f32 %v372_v11, %v326_v55 }
 0x9f7   :  { %v376_v10 = vpop.permute.xlu2 %375 }
 0x9f8   :  { %v378_v12 = vmul.f32 %v376_v10, %v372_v11 }
 0x9fa   :  { %380 = vrot.lane.b32.xlu0 %v378_v12, %s773_s20 }
 0xa6c   :  { %v381_v13 = vpop.permute.xlu0 %380 }
 0xa6d   :  { %v383_v14 = vadd.f32 %v381_v13, %v328_v59 }
 0xa6f   :  { %674 = vtanh.f32 %v383_v14 }
 0xa75   :  { %v675_v15 = vpop.eup %674 }
 0xa76   :  { %387 = vrot.lane.b32.xlu1 %v675_v15, %s779_s2 }
 0xae8   :  { %v388_v17 = vpop.permute.xlu1 %387 }
 0xae9   :  { %v390_v19 = vmul.f32 %v388_v17, %v385_v16  ;;  %v526_v17 = vld [vmem:[#allocation3 + $0x1c] sm:$0xf] }
 0xaeb   :  { %v392_v20 = vadd.f32 %v391_v18, %v390_v19 }
 0xaed   :  { %396 = vrot.lane.b32.xlu2 %v392_v20, %s779_s2 }
 0xb47   :  { %v397_v21 = vpop.permute.xlu2 %396 }
 0xb48   :  { %629 = vmatmul.msk.f32.vlgmr.msrb.gmra.mxu1 %vm63_vm1, %v397_v21 }
 0xbc5   :  { %v417_v22 = vpop.f32.mrf.mxu1 }
 0xbc6   :  { %v418_v23 = vadd.f32 %v815_v6, %v417_v22 }
 0xbc8   :  { %441 = vrot.lane.b32.xlu0 %v418_v23, %s773_s20  ;;  %v420_v25 = vadd.f32 %v418_v23, %v394_v24 }
 0xbca   :  { %v630_v26 = vmul.f32 -1.442695, %v420_v25 }
 0xbcc   :  { %676 = vpow2.f32 %v630_v26 }
 0xbd2   :  { %v677_v27 = vpop.eup %676 }
 0xbd3   :  { %v424_v28 = vadd.f32 1.0, %v677_v27 }
 0xbd5   :  { %678 = vrcp.f32 %v424_v28  ;;  %v436_v34 = vand.u32 2147483648, %v424_v28  ;;  %vm430_vm9 = vweird.f32 %v424_v28  ;;  %v434_v35 = vand.u32 2147483647, %v424_v28 }
 0xbd7   :  { %v437_v37 = vor.u32 1.1754944e-38, %v436_v34  ;;  %vm435_vm11 = vcmp.eq.f32.partialorder %v434_v35, 8.507059e+37 }
 0xbdb   :  { %v679_v29 = vpop.eup %678 }
 0xbdc   :  { %v426_v30 = vmul.f32 %v679_v29, %v424_v28  ;;  %vm431_vm8 = vweird.f32 %v679_v29 }
 0xbdd   :  { %vm432_vm10 = vmor %vm430_vm9, %vm431_vm8 }
 0xbde   :  { %v427_v31 = vsub.f32 1.0, %v426_v30 }
 0xbe0   :  { %v428_v32 = vmul.f32 %v679_v29, %v427_v31 }
 0xbe2   :  { %v429_v33 = vadd.f32 %v679_v29, %v428_v32 }
 0xbe4   :  { %v433_v36 = vsel %vm432_vm10, %v679_v29, %v429_v33 }
 0xbe5   :  { %v438_v39 = vsel %vm435_vm11, %v437_v37, %v433_v36 }
 0xbe6   :  { %v451_v44 = vsub.f32 1.0, %v438_v39  ;;  %v457_v46 = vmul.f32 %v438_v39, %v392_v20 }
 0xc3a   :  { %v442_v38 = vpop.permute.xlu0 %441 }
 0xc3b   :  { %v444_v40 = vmul.f32 %v442_v38, %v438_v39 }
 0xc3d   :  { %446 = vrot.lane.b32.xlu1 %v444_v40, %s773_s20 }
 0xcaf   :  { %v447_v41 = vpop.permute.xlu1 %446 }
 0xcb0   :  { %v449_v42 = vadd.f32 %v447_v41, %v394_v24 }
 0xcb2   :  { %680 = vtanh.f32 %v449_v42 }
 0xcb8   :  { %v681_v43 = vpop.eup %680 }
 0xcb9   :  { %453 = vrot.lane.b32.xlu2 %v681_v43, %s779_s2 }
 0xd13   :  { %v454_v45 = vpop.permute.xlu2 %453 }
 0xd14   :  { %v456_v47 = vmul.f32 %v454_v45, %v451_v44 }
 0xd16   :  { %v458_v48 = vadd.f32 %v457_v46, %v456_v47 }
 0xd18   :  { %462 = vrot.lane.b32.xlu0 %v458_v48, %s779_s2 }
 0xd8a   :  { %v463_v49 = vpop.permute.xlu0 %462 }
 0xd8b   :  { %631 = vmatmul.msk.f32.vlgmr.msrb.gmra.mxu2 %vm63_vm1, %v463_v49 }
 0xe0e   :  { %v483_v50 = vpop.f32.mrf.mxu2 }
 0xe0f   :  { %v484_v51 = vadd.f32 %v815_v6, %v483_v50 }
 0xe11   :  { %507 = vrot.lane.b32.xlu1 %v484_v51, %s773_s20  ;;  %v486_v53 = vadd.f32 %v484_v51, %v460_v52 }
 0xe13   :  { %v632_v54 = vmul.f32 -1.442695, %v486_v53 }
 0xe15   :  { %682 = vpow2.f32 %v632_v54 }
 0xe1b   :  { %v683_v55 = vpop.eup %682 }
 0xe1c   :  { %v490_v56 = vadd.f32 1.0, %v683_v55 }
 0xe1e   :  { %684 = vrcp.f32 %v490_v56  ;;  %v502_v62 = vand.u32 2147483648, %v490_v56  ;;  %vm496_vm13 = vweird.f32 %v490_v56  ;;  %v500_v63 = vand.u32 2147483647, %v490_v56 }
 0xe20   :  { %v503_v1 = vor.u32 1.1754944e-38, %v502_v62  ;;  %vm501_vm15 = vcmp.eq.f32.partialorder %v500_v63, 8.507059e+37 }
 0xe24   :  { %v685_v57 = vpop.eup %684 }
 0xe25   :  { %v492_v58 = vmul.f32 %v685_v57, %v490_v56  ;;  %vm497_vm12 = vweird.f32 %v685_v57 }
 0xe26   :  { %vm498_vm14 = vmor %vm496_vm13, %vm497_vm12 }
 0xe27   :  { %v493_v59 = vsub.f32 1.0, %v492_v58 }
 0xe29   :  { %v494_v60 = vmul.f32 %v685_v57, %v493_v59 }
 0xe2b   :  { %v495_v61 = vadd.f32 %v685_v57, %v494_v60 }
 0xe2d   :  { %v499_v0 = vsel %vm498_vm14, %v685_v57, %v495_v61 }
 0xe2e   :  { %v504_v3 = vsel %vm501_vm15, %v503_v1, %v499_v0 }
 0xe2f   :  { %v517_v9 = vsub.f32 1.0, %v504_v3  ;;  %v523_v11 = vmul.f32 %v504_v3, %v458_v48 }
 0xe83   :  { %v508_v2 = vpop.permute.xlu1 %507 }
 0xe84   :  { %v510_v4 = vmul.f32 %v508_v2, %v504_v3 }
 0xe86   :  { %512 = vrot.lane.b32.xlu2 %v510_v4, %s773_s20 }
 0xee0   :  { %v513_v5 = vpop.permute.xlu2 %512 }
 0xee1   :  { %v515_v7 = vadd.f32 %v513_v5, %v460_v52 }
 0xee3   :  { %686 = vtanh.f32 %v515_v7 }
 0xee9   :  { %v687_v8 = vpop.eup %686 }
 0xeea   :  { %519 = vrot.lane.b32.xlu0 %v687_v8, %s779_s2 }
 0xf5c   :  { %v520_v10 = vpop.permute.xlu0 %519 }
 0xf5d   :  { %v522_v12 = vmul.f32 %v520_v10, %v517_v9 }
 0xf5f   :  { %v524_v13 = vadd.f32 %v523_v11, %v522_v12 }
 0xf61   :  { %528 = vrot.lane.b32.xlu1 %v524_v13, %s779_s2 }
 0xfd3   :  { %v529_v14 = vpop.permute.xlu1 %528 }
 0xfd4   :  { %633 = vmatmul.msk.f32.vlgmr.msrb.gmra.mxu3 %vm63_vm1, %v529_v14 }
0x1057   :  { %v549_v15 = vpop.f32.mrf.mxu3 }
0x1058   :  { %v550_v16 = vadd.f32 %v815_v6, %v549_v15 }
0x105a   :  { %573 = vrot.lane.b32.xlu2 %v550_v16, %s773_s20  ;;  %v552_v18 = vadd.f32 %v550_v16, %v526_v17 }
0x105c   :  { %v634_v19 = vmul.f32 -1.442695, %v552_v18 }
0x105e   :  { %688 = vpow2.f32 %v634_v19 }
0x1064   :  { %v689_v20 = vpop.eup %688 }
0x1065   :  { %v556_v21 = vadd.f32 1.0, %v689_v20 }
0x1067   :  { %690 = vrcp.f32 %v556_v21  ;;  %v568_v27 = vand.u32 2147483648, %v556_v21  ;;  %vm562_vm1 = vweird.f32 %v556_v21  ;;  %v566_v28 = vand.u32 2147483647, %v556_v21 }
0x1069   :  { %v569_v29 = vor.u32 1.1754944e-38, %v568_v27  ;;  %vm567_vm4 = vcmp.eq.f32.partialorder %v566_v28, 8.507059e+37 }
0x106d   :  { %v691_v22 = vpop.eup %690 }
0x106e   :  { %v558_v23 = vmul.f32 %v691_v22, %v556_v21  ;;  %vm563_vm2 = vweird.f32 %v691_v22 }
0x106f   :  { %vm564_vm3 = vmor %vm562_vm1, %vm563_vm2 }
0x1070   :  { %v559_v24 = vsub.f32 1.0, %v558_v23 }
0x1072   :  { %v560_v25 = vmul.f32 %v691_v22, %v559_v24 }
0x1074   :  { %v561_v26 = vadd.f32 %v691_v22, %v560_v25 }
0x1076   :  { %v565_v6 = vsel %vm564_vm3, %v691_v22, %v561_v26 }
0x1077   :  { %v570_v31 = vsel %vm567_vm4, %v569_v29, %v565_v6 }
0x1078   :  { %v583_v36 = vsub.f32 1.0, %v570_v31  ;;  %v589_v38 = vmul.f32 %v570_v31, %v524_v13 }
0x10b4   :  { %v574_v30 = vpop.permute.xlu2 %573 }
0x10b5   :  { %v576_v32 = vmul.f32 %v574_v30, %v570_v31 }
0x10b7   :  { %578 = vrot.lane.b32.xlu0 %v576_v32, %s773_s20 }
0x1129   :  { %v579_v33 = vpop.permute.xlu0 %578 }
0x112a   :  { %v581_v34 = vadd.f32 %v579_v33, %v526_v17 }
0x112c   :  { %692 = vtanh.f32 %v581_v34 }
0x1132   :  { %v693_v35 = vpop.eup %692 }
0x1133   :  { %585 = vrot.lane.b32.xlu1 %v693_v35, %s779_s2 }
0x11a5   :  { %v586_v37 = vpop.permute.xlu1 %585 }
0x11a6   :  { %v588_v39 = vmul.f32 %v586_v37, %v583_v36 }
0x11a8   :  { %v590_v40 = vadd.f32 %v589_v38, %v588_v39 }
0x11aa   :  { %592 = vrot.lane.b32.xlu2 %v590_v40, %s779_s2 }
0x1204   :  { %v593_v41 = vpop.permute.xlu2 %592 }
0x1205   :  { %596 = vst.msk [vmem:[#allocation2] sm:$0xf] %vm51_vm0, %v593_v41 }
0x1206   :  { %600 = vst.msk [vmem:[#allocation8] sm:$0xf] %vm51_vm0, %v593_v41 }
0x1207   :  { %611 = dma.vmem_to_hbm [thread:$0]  %s607_s28, 64, %s609_s4, [#allocation5]  }
0x1208   :  { %770 = dma.done.wait [#allocation5], 64  }
0x1209   :  { %771 = vsyncadd [#allocation5], 4294967232 }
0x120a   :  { %616 = vsyncpa [#allocation4], 1 }
0x120b   :  { %617 = vsyncpa [#allocation7], 1 }
0x120c   :  { %618 = vsyncpa [#allocation5], 1 }

</bundles_post_ra>
